<compile_context>
chip_gen: v7x
topology: tpu7x:2x2x1
jax: 0.10.0
libtpu: 0.0.40
codegen_flags: <defaults>
</compile_context>

<pallas_src>
import functools

import jax
import jax.numpy as jnp
from jax.experimental import pallas as pl
from jax.experimental.pallas import tpu as pltpu


def _round_up(a: int, b: int) -> int:
    return (a + b - 1) // b * b


def mesh_graph_mlp_kernel(x_ref, w1_ref, b1_ref, w2_ref, vecs_ref, g_ref,
                          o_ref, *, eps):
    """One row tile: Linear -> SiLU -> Linear -> (grouped) LayerNorm.

    A kernel row may hold `pack` consecutive logical rows side by side along
    the lane axis; the weights are block-diagonal and b1/b2/gamma/beta are
    tiled accordingly (see prepare_mesh_graph_mlp_params), so the matmuls and
    the elementwise math are oblivious to the packing.  The per-group
    LayerNorm statistics run on the MXU via the block-diagonal averaging
    matrix G (G[j, l] = 1/out_dim iff j and l belong to the same logical
    row's feature group), which reduces AND broadcasts the group mean in one
    matmul, freeing the VPU/XLU slots.
    """
    # Linear 1: storage dtype (f32 or bf16) straight to the MXU, f32 accumulate.
    h = jnp.dot(x_ref[...], w1_ref[...],
                preferred_element_type=jnp.float32) + b1_ref[...]
    # SiLU in f32 (EUP sigmoid).
    h = h * jax.nn.sigmoid(h)
    # Linear 2 (activation cast back to the weight dtype for a bf16 MXU pass).
    y = jnp.dot(h.astype(w2_ref.dtype), w2_ref[...],
                preferred_element_type=jnp.float32) + vecs_ref[0:1, :]

    # Grouped LayerNorm, single pass: group means of y and y*y via the MXU.
    mean = jnp.dot(y, g_ref[...], preferred_element_type=jnp.float32)
    mean_sq = jnp.dot(y * y, g_ref[...], preferred_element_type=jnp.float32)
    # Single-pass variance; clamp guards E[y^2] - E[y]^2 against tiny negatives.
    var = jnp.maximum(mean_sq - mean * mean, 0.0)
    out = (y - mean) * jax.lax.rsqrt(var + eps) * vecs_ref[1:2, :] \
        + vecs_ref[2:3, :]
    o_ref[...] = out.astype(o_ref.dtype)


def prepare_mesh_graph_mlp_params(w1, b1, w2, b2, gamma, beta, *, pack=1):
    """Pack MLP parameters for mesh_graph_mlp_apply (call once, reuse).

    w1: [in, hid]  (= PyTorch W1.T),  b1: [hid]
    w2: [hid, out] (= PyTorch W2.T),  b2/gamma/beta: [out]
    With pack > 1 the weights become block-diagonal and the vectors are tiled
    so `pack` logical rows can share one lane-dense kernel row.
    """
    f32 = jnp.float32
    out_dim = w2.shape[1]
    if pack > 1:
        w1 = jnp.kron(jnp.eye(pack, dtype=w1.dtype), w1)
        w2 = jnp.kron(jnp.eye(pack, dtype=w2.dtype), w2)
        b1 = jnp.tile(b1, pack)
        b2 = jnp.tile(b2, pack)
        gamma = jnp.tile(gamma, pack)
        beta = jnp.tile(beta, pack)
    # Block-diagonal group-averaging matrix for the LN statistic matmuls.
    g_mat = jnp.kron(jnp.eye(pack, dtype=f32),
                     jnp.full((out_dim, out_dim), 1.0 / out_dim, f32))
    vecs = jnp.stack([b2.astype(f32), gamma.astype(f32), beta.astype(f32)])
    return (w1, b1.astype(f32).reshape(1, -1), w2, vecs, g_mat)


@functools.partial(jax.jit, static_argnames=("tile_m", "eps"))
def mesh_graph_mlp_apply(x, params, *, tile_m=8192, eps=1e-5):
    """x: [N, input_dim] (f32 or bf16) -> [N, output_dim] in x.dtype."""
    w1, b1, w2, vecs, g_mat = params
    n, in_dim = x.shape
    k_in, k_hid = w1.shape
    k_out = w2.shape[1]
    pack = k_in // in_dim
    assert k_in == pack * in_dim and n % pack == 0, (n, in_dim, k_in)
    rows = n // pack
    out_dim = k_out // pack

    # (n, in_dim) -> (rows, pack*in_dim): row-major bit-identical, free.
    x_k = x.reshape(rows, k_in)

    # Row tile: as large as a ~32 MiB VMEM working-set budget allows
    # (double-buffered x/out blocks + f32 temporaries), capped by tile_m and
    # rounded to a multiple of 16 sublanes (bf16-friendly).  Small problems
    # run as one full-extent tile (no forced split on single-TC v5e/v6e);
    # large single-tile problems are split into 2 steps so v7x's two
    # TensorCores both get work and DMA overlaps compute.  No padding: the
    # grid is cdiv and the ragged boundary block is handled by Pallas (row
    # independence makes stale boundary rows harmless).
    per_row = (2 * k_in * x.dtype.itemsize + 2 * k_out * x.dtype.itemsize
               + 4 * (k_hid + 5 * k_out))
    tile = max(16, min(tile_m, (32 * 1024 * 1024) // per_row))
    tile = (tile // 16) * 16
    if rows >= 4096 and tile >= rows:
        tile = _round_up(pl.cdiv(rows, 2), 16)
    if tile >= rows:
        tile = rows                      # single full block (always legal)
    grid = pl.cdiv(rows, tile)

    kernel = functools.partial(mesh_graph_mlp_kernel, eps=eps)
    out = pl.pallas_call(
        kernel,
        out_shape=jax.ShapeDtypeStruct((rows, k_out), x.dtype),
        grid_spec=pltpu.PrefetchScalarGridSpec(
            num_scalar_prefetch=0,
            grid=(grid,),
            in_specs=[
                pl.BlockSpec((tile, k_in), lambda i: (i, 0)),
                # Grid-invariant operands (constant index_map): fetched once
                # and resident in VMEM across all grid steps.
                pl.BlockSpec((k_in, k_hid), lambda i: (0, 0)),
                pl.BlockSpec((1, k_hid), lambda i: (0, 0)),
                pl.BlockSpec((k_hid, k_out), lambda i: (0, 0)),
                pl.BlockSpec((3, k_out), lambda i: (0, 0)),
                pl.BlockSpec((k_out, k_out), lambda i: (0, 0)),
            ],
            out_specs=pl.BlockSpec((tile, k_out), lambda i: (i, 0)),
        ),
        compiler_params=pltpu.CompilerParams(
            dimension_semantics=("parallel",),
            vmem_limit_bytes=48 * 1024 * 1024),
    )(x_k, w1, b1, w2, vecs, g_mat)

    # (rows, pack*out_dim) is row-major bit-identical to (n, out_dim): free.
    return out.reshape(n, out_dim)


def mesh_graph_mlp(x, w1, b1, w2, b2, gamma, beta, *, tile_m=8192, eps=1e-5):
    """Convenience wrapper: prep params + apply (hoist prep when calling in a loop)."""
    n = x.shape[0]
    out_dim = w2.shape[1]
    # Pack two logical rows per kernel row when that makes the output lane
    # width a multiple of 128 (e.g. out_dim == 64): unmasked lane-dense
    # stores.  Other sub-128 out_dims (or odd N) fall back to pack=1, which
    # is correct but uses masked stores rather than paying a full-array pad.
    pack = 2 if (out_dim % 128 != 0 and (2 * out_dim) % 128 == 0
                 and n % 2 == 0) else 1
    params = prepare_mesh_graph_mlp_params(w1, b1, w2, b2, gamma, beta,
                                           pack=pack)
    return mesh_graph_mlp_apply(x, params, tile_m=tile_m, eps=eps)


def reference_mlp(x, w1, b1, w2, b2, gamma, beta, eps=1e-5):
    hi = jax.lax.Precision.HIGHEST
    x = x.astype(jnp.float32)
    h = jnp.dot(x, w1.astype(jnp.float32), precision=hi) + b1
    h = h * jax.nn.sigmoid(h)
    y = jnp.dot(h, w2.astype(jnp.float32), precision=hi) + b2
    mean = jnp.mean(y, axis=-1, keepdims=True)
    var = jnp.mean((y - mean) ** 2, axis=-1, keepdims=True)
    return (y - mean) * jax.lax.rsqrt(var + eps) * gamma + beta


if __name__ == "__main__":
    # MeshGraphMLP(input_dim=32, output_dim=64, hidden_dim=64, hidden_layers=1,
    #              activation_fn=SiLU, norm_type="LayerNorm")
    N = 250          # deliberately NOT a tile multiple
    INPUT_DIM = 32
    HIDDEN_DIM = 64
    OUTPUT_DIM = 64

    key = jax.random.PRNGKey(0)
    kx, kw1, kb1, kw2, kb2 = jax.random.split(key, 5)

    x = jax.random.normal(kx, (N, INPUT_DIM), dtype=jnp.float32)

    # Deterministic init mimicking PyTorch Linear uniform(-1/sqrt(fan_in), ...)
    bound1 = 1.0 / (INPUT_DIM ** 0.5)
    w1 = jax.random.uniform(kw1, (INPUT_DIM, HIDDEN_DIM), jnp.float32,
                            -bound1, bound1)       # (in, hidden) = W1.T
    b1 = jax.random.uniform(kb1, (HIDDEN_DIM,), jnp.float32, -bound1, bound1)

    bound2 = 1.0 / (HIDDEN_DIM ** 0.5)
    w2 = jax.random.uniform(kw2, (HIDDEN_DIM, OUTPUT_DIM), jnp.float32,
                            -bound2, bound2)       # (hidden, out) = W2.T
    b2 = jax.random.uniform(kb2, (OUTPUT_DIM,), jnp.float32, -bound2, bound2)

    gamma = jnp.ones((OUTPUT_DIM,), jnp.float32)   # LayerNorm weight
    beta = jnp.zeros((OUTPUT_DIM,), jnp.float32)   # LayerNorm bias

    ref = reference_mlp(x, w1, b1, w2, b2, gamma, beta)

    # ---- f32 storage path (single full tile, grid == 1) --------------------
    # Tolerance covers the MXU possibly running default-precision (bf16-pass)
    # matmuls on some generations; with full-f32 MXU passes the error is ~1e-6.
    out = jax.block_until_ready(mesh_graph_mlp(x, w1, b1, w2, b2, gamma, beta))
    assert out.shape == (N, OUTPUT_DIM)
    assert jnp.allclose(out, ref, atol=3e-2, rtol=3e-2), \
        float(jnp.max(jnp.abs(out - ref)))

    # ---- small forced tile: exercises the padding-free ragged boundary -----
    out_rt = jax.block_until_ready(
        mesh_graph_mlp(x, w1, b1, w2, b2, gamma, beta, tile_m=64))
    assert jnp.allclose(out_rt, ref, atol=3e-2, rtol=3e-2), \
        float(jnp.max(jnp.abs(out_rt - ref)))

    # ---- bf16 storage path (halves HBM traffic; LN math stays in f32) ------
    out_bf = jax.block_until_ready(
        mesh_graph_mlp(x.astype(jnp.bfloat16), w1.astype(jnp.bfloat16), b1,
                       w2.astype(jnp.bfloat16), b2, gamma, beta))
    ref_bf = reference_mlp(x.astype(jnp.bfloat16).astype(jnp.float32),
                           w1.astype(jnp.bfloat16).astype(jnp.float32), b1,
                           w2.astype(jnp.bfloat16).astype(jnp.float32), b2,
                           gamma, beta)
    assert out_bf.shape == (N, OUTPUT_DIM) and out_bf.dtype == jnp.bfloat16
    assert jnp.allclose(out_bf.astype(jnp.float32), ref_bf,
                        atol=2e-1, rtol=2e-1)

    print("KERNEL_OK")
</pallas_src>

<mosaic_0001>
module attributes {stable_mosaic.version = 11 : i64} {
  func.func @mesh_graph_mlp_kernel(%arg0: i32, %arg1: memref<125x64xf32, #tpu.memory_space<vmem>>, %arg2: memref<64x128xf32, #tpu.memory_space<vmem>>, %arg3: memref<1x128xf32, #tpu.memory_space<vmem>>, %arg4: memref<128x128xf32, #tpu.memory_space<vmem>>, %arg5: memref<3x128xf32, #tpu.memory_space<vmem>>, %arg6: memref<128x128xf32, #tpu.memory_space<vmem>>, %arg7: memref<125x128xf32, #tpu.memory_space<vmem>>) attributes {dimension_semantics = [#tpu.dimension_semantics<parallel>], iteration_bounds = array<i64: 1>, scalar_prefetch = 0 : i64, scratch_operands = 0 : i64, tpu.core_type = #tpu.core_type<tc>, window_params = [{transform_indices = @transform_0, window_bounds = array<i64: 125, 64>}, {pipeline_mode = #tpu.pipeline_mode<synchronous>, transform_indices = @transform_1, window_bounds = array<i64: 64, 128>}, {pipeline_mode = #tpu.pipeline_mode<synchronous>, transform_indices = @transform_2, window_bounds = array<i64: 1, 128>}, {pipeline_mode = #tpu.pipeline_mode<synchronous>, transform_indices = @transform_3, window_bounds = array<i64: 128, 128>}, {pipeline_mode = #tpu.pipeline_mode<synchronous>, transform_indices = @transform_4, window_bounds = array<i64: 3, 128>}, {pipeline_mode = #tpu.pipeline_mode<synchronous>, transform_indices = @transform_5, window_bounds = array<i64: 128, 128>}, {transform_indices = @transform_6, window_bounds = array<i64: 125, 128>}]} {
    %c0 = arith.constant 0 : index
    %c0_0 = arith.constant 0 : index
    %0 = vector.load %arg1[%c0, %c0_0] : memref<125x64xf32, #tpu.memory_space<vmem>>, vector<125x64xf32>
    %c0_1 = arith.constant 0 : index
    %c0_2 = arith.constant 0 : index
    %1 = vector.load %arg2[%c0_1, %c0_2] : memref<64x128xf32, #tpu.memory_space<vmem>>, vector<64x128xf32>
    %cst = arith.constant dense<0.000000e+00> : vector<125x128xf32>
    %2 = tpu.matmul %0, %1, %cst {dimension_numbers = #tpu.dot_dimension_numbers<[1], [0], [0], [1], [0, 0, 1, 1], [], []>} : vector<125x64xf32>, vector<64x128xf32>, vector<125x128xf32> -> vector<125x128xf32>
    %c0_3 = arith.constant 0 : index
    %c0_4 = arith.constant 0 : index
    %3 = vector.load %arg3[%c0_3, %c0_4] : memref<1x128xf32, #tpu.memory_space<vmem>>, vector<1x128xf32>
    %4 = vector.broadcast %3 : vector<1x128xf32> to vector<125x128xf32>
    %5 = arith.addf %2, %4 : vector<125x128xf32>
    %6 = arith.negf %5 : vector<125x128xf32>
    %7 = math.exp %6 : vector<125x128xf32>
    %cst_5 = arith.constant 1.000000e+00 : f32
    %8 = vector.broadcast %cst_5 : f32 to vector<125x128xf32>
    %9 = arith.addf %8, %7 : vector<125x128xf32>
    %10 = arith.divf %8, %9 : vector<125x128xf32>
    %11 = arith.mulf %5, %10 : vector<125x128xf32>
    %c0_6 = arith.constant 0 : index
    %c0_7 = arith.constant 0 : index
    %12 = vector.load %arg4[%c0_6, %c0_7] : memref<128x128xf32, #tpu.memory_space<vmem>>, vector<128x128xf32>
    %cst_8 = arith.constant dense<0.000000e+00> : vector<125x128xf32>
    %13 = tpu.matmul %11, %12, %cst_8 {dimension_numbers = #tpu.dot_dimension_numbers<[1], [0], [0], [1], [0, 0, 1, 1], [], []>} : vector<125x128xf32>, vector<128x128xf32>, vector<125x128xf32> -> vector<125x128xf32>
    %c0_9 = arith.constant 0 : index
    %c0_10 = arith.constant 0 : index
    %14 = vector.load %arg5[%c0_9, %c0_10] : memref<3x128xf32, #tpu.memory_space<vmem>>, vector<1x128xf32>
    %15 = vector.broadcast %14 : vector<1x128xf32> to vector<125x128xf32>
    %16 = arith.addf %13, %15 : vector<125x128xf32>
    %c0_11 = arith.constant 0 : index
    %c0_12 = arith.constant 0 : index
    %17 = vector.load %arg6[%c0_11, %c0_12] : memref<128x128xf32, #tpu.memory_space<vmem>>, vector<128x128xf32>
    %cst_13 = arith.constant dense<0.000000e+00> : vector<125x128xf32>
    %18 = tpu.matmul %16, %17, %cst_13 {dimension_numbers = #tpu.dot_dimension_numbers<[1], [0], [0], [1], [0, 0, 1, 1], [], []>} : vector<125x128xf32>, vector<128x128xf32>, vector<125x128xf32> -> vector<125x128xf32>
    %19 = arith.mulf %16, %16 : vector<125x128xf32>
    %c0_14 = arith.constant 0 : index
    %c0_15 = arith.constant 0 : index
    %20 = vector.load %arg6[%c0_14, %c0_15] : memref<128x128xf32, #tpu.memory_space<vmem>>, vector<128x128xf32>
    %cst_16 = arith.constant dense<0.000000e+00> : vector<125x128xf32>
    %21 = tpu.matmul %19, %20, %cst_16 {dimension_numbers = #tpu.dot_dimension_numbers<[1], [0], [0], [1], [0, 0, 1, 1], [], []>} : vector<125x128xf32>, vector<128x128xf32>, vector<125x128xf32> -> vector<125x128xf32>
    %22 = arith.mulf %18, %18 : vector<125x128xf32>
    %23 = arith.subf %21, %22 : vector<125x128xf32>
    %cst_17 = arith.constant 0.000000e+00 : f32
    %24 = vector.broadcast %cst_17 : f32 to vector<125x128xf32>
    %25 = arith.maximumf %23, %24 : vector<125x128xf32>
    %26 = arith.subf %16, %18 : vector<125x128xf32>
    %cst_18 = arith.constant 9.99999974E-6 : f32
    %27 = vector.broadcast %cst_18 : f32 to vector<125x128xf32>
    %28 = arith.addf %25, %27 : vector<125x128xf32>
    %29 = math.rsqrt %28 : vector<125x128xf32>
    %30 = arith.mulf %26, %29 : vector<125x128xf32>
    %c1 = arith.constant 1 : index
    %c0_19 = arith.constant 0 : index
    %31 = vector.load %arg5[%c1, %c0_19] : memref<3x128xf32, #tpu.memory_space<vmem>>, vector<1x128xf32>
    %32 = vector.broadcast %31 : vector<1x128xf32> to vector<125x128xf32>
    %33 = arith.mulf %30, %32 : vector<125x128xf32>
    %c2 = arith.constant 2 : index
    %c0_20 = arith.constant 0 : index
    %34 = vector.load %arg5[%c2, %c0_20] : memref<3x128xf32, #tpu.memory_space<vmem>>, vector<1x128xf32>
    %35 = vector.broadcast %34 : vector<1x128xf32> to vector<125x128xf32>
    %36 = arith.addf %33, %35 : vector<125x128xf32>
    %c0_21 = arith.constant 0 : index
    %c0_22 = arith.constant 0 : index
    %37 = vector.load %arg7[%c0_21, %c0_22] : memref<125x128xf32, #tpu.memory_space<vmem>>, vector<125x128xf32>
    tpu.vector_store %arg7[%c0_21, %c0_22], %36 {strides = array<i32>} : memref<125x128xf32, #tpu.memory_space<vmem>>, vector<125x128xf32>,
    return
  }
  func.func @transform_0(%arg0: i32) -> (i32, i32) {
    %c0_i32 = arith.constant 0 : i32
    %c0_i32_0 = arith.constant 0 : i32
    return %arg0, %c0_i32 : i32, i32
  }
  func.func @transform_1(%arg0: i32) -> (i32, i32) {
    %c0_i32 = arith.constant 0 : i32
    %c0_i32_0 = arith.constant 0 : i32
    %c0_i32_1 = arith.constant 0 : i32
    return %c0_i32, %c0_i32_0 : i32, i32
  }
  func.func @transform_2(%arg0: i32) -> (i32, i32) {
    %c0_i32 = arith.constant 0 : i32
    %c0_i32_0 = arith.constant 0 : i32
    %c0_i32_1 = arith.constant 0 : i32
    return %c0_i32, %c0_i32_0 : i32, i32
  }
  func.func @transform_3(%arg0: i32) -> (i32, i32) {
    %c0_i32 = arith.constant 0 : i32
    %c0_i32_0 = arith.constant 0 : i32
    %c0_i32_1 = arith.constant 0 : i32
    return %c0_i32, %c0_i32_0 : i32, i32
  }
  func.func @transform_4(%arg0: i32) -> (i32, i32) {
    %c0_i32 = arith.constant 0 : i32
    %c0_i32_0 = arith.constant 0 : i32
    %c0_i32_1 = arith.constant 0 : i32
    return %c0_i32, %c0_i32_0 : i32, i32
  }
  func.func @transform_5(%arg0: i32) -> (i32, i32) {
    %c0_i32 = arith.constant 0 : i32
    %c0_i32_0 = arith.constant 0 : i32
    %c0_i32_1 = arith.constant 0 : i32
    return %c0_i32, %c0_i32_0 : i32, i32
  }
  func.func @transform_6(%arg0: i32) -> (i32, i32) {
    %c0_i32 = arith.constant 0 : i32
    %c0_i32_0 = arith.constant 0 : i32
    return %arg0, %c0_i32 : i32, i32
  }
}

</mosaic_0001>

<bundles_post_ra>
// kernel: mesh_graph_mlp_apply.1
= control target key start
LH: loop header
LB: loop body
LE: loop exit
PB: predicated region body
PF: predicated region fallthrough
CT: control target
= control target key end

     0   :  { %vm54_vm0 = vcmask 523264   ;;  %s2272_s1 = inlined_call_operand.vmem [shape: f32[64,128], index: 1, kind: input, shape index: {}]   ;;  %s2273_s0 = inlined_call_operand.vmem [shape: f32[125,64], index: 0, kind: input, shape index: {}]   ;;  %s2274_s3 = inlined_call_operand.vmem [shape: f32[128,128], index: 3, kind: input, shape index: {}]   ;;  %s2275_s5 = inlined_call_operand.vmem [shape: f32[128,128], index: 5, kind: input, shape index: {}]   ;;  %s2276_s2 = inlined_call_operand.vmem [shape: f32[1,128], index: 2, kind: input, shape index: {}]   ;;  %s2277_s4 = inlined_call_operand.vmem [shape: f32[3,128], index: 4, kind: input, shape index: {}]   ;;  %s2278_s6 = inlined_call_operand.vmem [shape: f32[125,128], index: 6, kind: output, shape index: {}]  }
   0x1   :  { %v39_v0 = vld [vmem:[%s2272_s1] sm:$0xff]  ;;  %v40_v1 = vld [vmem:[%s2272_s1 + $0x8] sm:$0xff]  ;;  %v41_v2 = vld [vmem:[%s2272_s1 + $0x10] sm:$0xff] }
   0x2   :  { %v1386_v3 = vpack.c.bf16 %v40_v1, %v39_v0  ;;  %v42_v4 = vld [vmem:[%s2272_s1 + $0x18] sm:$0xff]  ;;  %v43_v6 = vld [vmem:[%s2272_s1 + $0x20] sm:$0xff]  ;;  %v44_v7 = vld [vmem:[%s2272_s1 + $0x28] sm:$0xff] }
   0x3   :  { %v1390_v5 = vpack.c.bf16 %v42_v4, %v41_v2  ;;  %v23_v8 = vld [vmem:[%s2273_s0] sm:$0xff]  ;;  %v1394_v9 = vpack.c.bf16 %v44_v7, %v43_v6  ;;  %v45_v10 = vld [vmem:[%s2272_s1 + $0x30] sm:$0xff]  ;;  %v46_v11 = vld [vmem:[%s2272_s1 + $0x38] sm:$0xff] }
   0x4   :  { %1387 = vmatprep.subr.bf16.mxu0 %v1386_v3  ;;  %1194 = vmatprep.mubr.msk.f32.mxu0 %vm54_vm0, %v23_v8  ;;  %v1398_v12 = vpack.c.bf16 %v46_v11, %v45_v10  ;;  %v24_v13 = vld [vmem:[%s2273_s0 + $0x8] sm:$0xff]  ;;  %v25_v14 = vld [vmem:[%s2273_s0 + $0x10] sm:$0xff]  ;;  %v26_v15 = vld [vmem:[%s2273_s0 + $0x18] sm:$0xff] }
   0x5   :  { %1389 = vmatpush3.bf16.msra.mxu0 %v1386_v3  ;;  %v27_v16 = vld [vmem:[%s2273_s0 + $0x20] sm:$0xff]  ;;  %v28_v17 = vld [vmem:[%s2273_s0 + $0x28] sm:$0xff]  ;;  %v29_v18 = vld [vmem:[%s2273_s0 + $0x30] sm:$0xff] }
   0x6   :  { %1391 = vmatprep.subr.bf16.mxu0 %v1390_v5  ;;  %v30_v19 = vld [vmem:[%s2273_s0 + $0x38] sm:$0xff]  ;;  %v31_v20 = vld [vmem:[%s2273_s0 + $0x40] sm:$0xff]  ;;  %v32_v21 = vld [vmem:[%s2273_s0 + $0x48] sm:$0xff] }
   0x7   :  { %v33_v22 = vld [vmem:[%s2273_s0 + $0x50] sm:$0xff]  ;;  %v34_v23 = vld [vmem:[%s2273_s0 + $0x58] sm:$0xff]  ;;  %v35_v24 = vld [vmem:[%s2273_s0 + $0x60] sm:$0xff] }
   0x8   :  { %v36_v25 = vld [vmem:[%s2273_s0 + $0x68] sm:$0xff]  ;;  %v37_v26 = vld [vmem:[%s2273_s0 + $0x70] sm:$0xff]  ;;  %v38_v27 = vld [vmem:[%s2273_s0 + $0x78] sm:$0x1f] }
   0x9   :  { %1393 = vmatpush3.bf16.msra.mxu0 %v1390_v5  ;;  %v360_v28 = vld [vmem:[%s2274_s3] sm:$0xff]  ;;  %v361_v29 = vld [vmem:[%s2274_s3 + $0x8] sm:$0xff]  ;;  %v362_v31 = vld [vmem:[%s2274_s3 + $0x10] sm:$0xff] }
   0xa   :  { %1395 = vmatprep.subr.bf16.mxu0 %v1394_v9  ;;  %v1402_v30 = vpack.c.bf16 %v361_v29, %v360_v28  ;;  %v363_v32 = vld [vmem:[%s2274_s3 + $0x18] sm:$0xff]  ;;  %v364_v34 = vld [vmem:[%s2274_s3 + $0x20] sm:$0xff]  ;;  %v365_v35 = vld [vmem:[%s2274_s3 + $0x28] sm:$0xff] }
   0xb   :  { %v1406_v33 = vpack.c.bf16 %v363_v32, %v362_v31  ;;  %v1410_v36 = vpack.c.bf16 %v365_v35, %v364_v34  ;;  %v366_v37 = vld [vmem:[%s2274_s3 + $0x30] sm:$0xff]  ;;  %v367_v38 = vld [vmem:[%s2274_s3 + $0x38] sm:$0xff]  ;;  %v368_v40 = vld [vmem:[%s2274_s3 + $0x40] sm:$0xff] }
   0xc   :  { %1403 = vmatprep.subr.bf16.mxu1 %v1402_v30  ;;  %v1414_v39 = vpack.c.bf16 %v367_v38, %v366_v37  ;;  %v369_v41 = vld [vmem:[%s2274_s3 + $0x48] sm:$0xff]  ;;  %v370_v43 = vld [vmem:[%s2274_s3 + $0x50] sm:$0xff]  ;;  %v371_v44 = vld [vmem:[%s2274_s3 + $0x58] sm:$0xff] }
   0xd   :  { %1397 = vmatpush3.bf16.msra.mxu0 %v1394_v9  ;;  %1405 = vmatpush3.bf16.msra.mxu1 %v1402_v30  ;;  %v1418_v42 = vpack.c.bf16 %v369_v41, %v368_v40  ;;  %v1422_v45 = vpack.c.bf16 %v371_v44, %v370_v43  ;;  %v372_v46 = vld [vmem:[%s2274_s3 + $0x60] sm:$0xff]  ;;  %v373_v47 = vld [vmem:[%s2274_s3 + $0x68] sm:$0xff]  ;;  %v374_v49 = vld [vmem:[%s2274_s3 + $0x70] sm:$0xff] }
   0xe   :  { %1399 = vmatprep.subr.bf16.mxu0 %v1398_v12  ;;  %1407 = vmatprep.subr.bf16.mxu1 %v1406_v33  ;;  %v1426_v48 = vpack.c.bf16 %v373_v47, %v372_v46  ;;  %v375_v50 = vld [vmem:[%s2274_s3 + $0x78] sm:$0xff]  ;;  %v526_v52 = vld [vmem:[%s2275_s5] sm:$0xff]  ;;  %v527_v53 = vld [vmem:[%s2275_s5 + $0x8] sm:$0xff] }
   0xf   :  { %v1430_v51 = vpack.c.bf16 %v375_v50, %v374_v49  ;;  %v528_v54 = vld [vmem:[%s2275_s5 + $0x10] sm:$0xff]  ;;  %v1790_v55 = vpack.c.bf16 %v527_v53, %v526_v52  ;;  %v529_v56 = vld [vmem:[%s2275_s5 + $0x18] sm:$0xff]  ;;  %v530_v58 = vld [vmem:[%s2275_s5 + $0x20] sm:$0xff] }
  0x10   :  { %v1795_v57 = vpack.c.bf16 %v529_v56, %v528_v54  ;;  %v531_v59 = vld [vmem:[%s2275_s5 + $0x28] sm:$0xff]  ;;  %v532_v61 = vld [vmem:[%s2275_s5 + $0x30] sm:$0xff]  ;;  %v533_v62 = vld [vmem:[%s2275_s5 + $0x38] sm:$0xff] }
  0x11   :  { %1401 = vmatpush3.bf16.msra.mxu0 %v1398_v12  ;;  %1409 = vmatpush3.bf16.msra.mxu1 %v1406_v33  ;;  %v1807_v60 = vpack.c.bf16 %v531_v59, %v530_v58  ;;  %v1817_v63 = vpack.c.bf16 %v533_v62, %v532_v61  ;;  %v534_v0 = vld [vmem:[%s2275_s5 + $0x40] sm:$0xff]  ;;  %v535_v1 = vld [vmem:[%s2275_s5 + $0x48] sm:$0xff]  ;;  %v536_v3 = vld [vmem:[%s2275_s5 + $0x50] sm:$0xff] }
  0x12   :  { %1411 = vmatprep.subr.bf16.mxu1 %v1410_v36  ;;  %1435 = vmatprep.subr.bf16.mxu0 %v1790_v55  ;;  %v1827_v2 = vpack.c.bf16 %v535_v1, %v534_v0  ;;  %v537_v4 = vld [vmem:[%s2275_s5 + $0x58] sm:$0xff]  ;;  %v538_v6 = vld [vmem:[%s2275_s5 + $0x60] sm:$0xff]  ;;  %v539_v7 = vld [vmem:[%s2275_s5 + $0x68] sm:$0xff] }
  0x13   :  { %v1837_v5 = vpack.c.bf16 %v537_v4, %v536_v3  ;;  %v1847_v8 = vpack.c.bf16 %v539_v7, %v538_v6  ;;  %v1855_v9 = vld [vmem:[%s2276_s2] ss:$0 sm:$0xff] }
  0x14   :  { %1195 = vmatmul.mubr.msk.f32.vlgmr.msra.gmra.mrb[0].mxu0 %vm54_vm0, %v24_v13 }
  0x15   :  { %1197 = vmatprep.mubr.msk.f32.mxu0 %vm54_vm0, %v25_v14  ;;  %1413 = vmatpush3.bf16.msra.mxu1 %v1410_v36 }
  0x16   :  { %1415 = vmatprep.subr.bf16.mxu1 %v1414_v39  ;;  %1437 = vmatpush3.bf16.msra.mxu0 %v1790_v55 }
  0x17   :  { %1439 = vmatprep.subr.bf16.mxu0 %v1795_v57 }
  0x18   :  { %1198 = vmatmul.mubr.msk.f32.gmra.mrb[2].mxu0 %vm54_vm0, %v26_v15 }
  0x19   :  { %1200 = vmatprep.mubr.msk.f32.mxu0 %vm54_vm0, %v27_v16  ;;  %1417 = vmatpush3.bf16.msra.mxu1 %v1414_v39 }
  0x1a   :  { %1419 = vmatprep.subr.bf16.mxu1 %v1418_v42  ;;  %1441 = vmatpush3.bf16.msra.mxu0 %v1795_v57 }
  0x1b   :  { %1443 = vmatprep.subr.bf16.mxu0 %v1807_v60 }
  0x1c   :  { %1201 = vmatmul.mubr.msk.f32.gmra.mrb[4].mxu0 %vm54_vm0, %v28_v17 }
  0x1d   :  { %1203 = vmatprep.mubr.msk.f32.mxu0 %vm54_vm0, %v29_v18  ;;  %1421 = vmatpush3.bf16.msra.mxu1 %v1418_v42 }
  0x1e   :  { %1423 = vmatprep.subr.bf16.mxu1 %v1422_v45  ;;  %1445 = vmatpush3.bf16.msra.mxu0 %v1807_v60 }
  0x1f   :  { %1447 = vmatprep.subr.bf16.mxu0 %v1817_v63 }
  0x20   :  { %1204 = vmatmul.mubr.msk.f32.gmra.mrb[6].mxu0 %vm54_vm0, %v30_v19 }
  0x21   :  { %1206 = vmatprep.mubr.msk.f32.mxu0 %vm54_vm0, %v31_v20  ;;  %1425 = vmatpush3.bf16.msra.mxu1 %v1422_v45 }
  0x22   :  { %1427 = vmatprep.subr.bf16.mxu1 %v1426_v48  ;;  %1449 = vmatpush3.bf16.msra.mxu0 %v1817_v63 }
  0x23   :  { %1451 = vmatprep.subr.bf16.mxu0 %v1827_v2 }
  0x24   :  { %1207 = vmatmul.mubr.msk.f32.gmra.mrb[8].mxu0 %vm54_vm0, %v32_v21 }
  0x25   :  { %1209 = vmatprep.mubr.msk.f32.mxu0 %vm54_vm0, %v33_v22  ;;  %1429 = vmatpush3.bf16.msra.mxu1 %v1426_v48 }
  0x26   :  { %1431 = vmatprep.subr.bf16.mxu1 %v1430_v51  ;;  %1453 = vmatpush3.bf16.msra.mxu0 %v1827_v2 }
  0x27   :  { %1455 = vmatprep.subr.bf16.mxu0 %v1837_v5 }
  0x28   :  { %1210 = vmatmul.mubr.msk.f32.gmra.mrb[10].mxu0 %vm54_vm0, %v34_v23 }
  0x29   :  { %1212 = vmatprep.mubr.msk.f32.mxu0 %vm54_vm0, %v35_v24  ;;  %1433 = vmatpush3.bf16.msra.mxu1 %v1430_v51 }
  0x2a   :  { %1498 = vmatprep.subr.bf16.mxu1 %v1790_v55  ;;  %1457 = vmatpush3.bf16.msra.mxu0 %v1837_v5 }
  0x2b   :  { %1459 = vmatprep.subr.bf16.mxu0 %v1847_v8 }
  0x2c   :  { %1213 = vmatmul.mubr.msk.f32.gmra.mrb[12].mxu0 %vm54_vm0, %v36_v25 }
  0x2d   :  { %1215 = vmatprep.mubr.msk.f32.mxu0 %vm54_vm0, %v37_v26 }
  0x2e   :  { %1461 = vmatpush3.bf16.msra.mxu0 %v1847_v8 }
  0x30   :  { %1216 = vmatmul.mubr.msk.f32.gmra.mrb[14].mxu0 %vm54_vm0, %v38_v27 }
  0xe7   :  { %v1196_v10 = vpop.f32.mrb[0].mxu0 }
  0xe8   :  { %v1858_v11 = vadd.f32 %v1196_v10, %v1855_v9  ;;  %v169_v12 = vpop.f32.mrb[1].mxu0 }
  0xe9   :  { %v1861_v13 = vadd.f32 %v1855_v9, %v169_v12 }
  0xea   :  { %v1040_v14 = vmul.f32 -1.442695, %v1858_v11 }
  0xeb   :  { %v1039_v15 = vmul.f32 -1.442695, %v1861_v13  ;;  %v1199_v16 = vpop.f32.mrb[2].mxu0 }
  0xec   :  { %1514 = vpow2.f32 %v1040_v14  ;;  %v1866_v17 = vadd.f32 %v1199_v16, %v1855_v9  ;;  %v179_v18 = vpop.f32.mrb[3].mxu0 }
  0xed   :  { %1516 = vpow2.f32 %v1039_v15  ;;  %v1869_v19 = vadd.f32 %v1855_v9, %v179_v18 }
  0xee   :  { %v1042_v20 = vmul.f32 -1.442695, %v1866_v17 }
  0xef   :  { %v1041_v21 = vmul.f32 -1.442695, %v1869_v19  ;;  %v1202_v22 = vpop.f32.mrb[4].mxu0 }
  0xf0   :  { %1518 = vpow2.f32 %v1042_v20  ;;  %v1874_v23 = vadd.f32 %v1202_v22, %v1855_v9  ;;  %v189_v24 = vpop.f32.mrb[5].mxu0 }
  0xf1   :  { %1520 = vpow2.f32 %v1041_v21  ;;  %v1877_v25 = vadd.f32 %v1855_v9, %v189_v24 }
  0xf2   :  { %v1044_v26 = vmul.f32 -1.442695, %v1874_v23 }
  0xf3   :  { %v1043_v27 = vmul.f32 -1.442695, %v1877_v25  ;;  %v1205_v28 = vpop.f32.mrb[6].mxu0 }
  0xf4   :  { %1522 = vpow2.f32 %v1044_v26  ;;  %v1882_v29 = vadd.f32 %v1205_v28, %v1855_v9  ;;  %v199_v30 = vpop.f32.mrb[7].mxu0 }
  0xf5   :  { %1524 = vpow2.f32 %v1043_v27  ;;  %v1885_v31 = vadd.f32 %v1855_v9, %v199_v30 }
  0xf6   :  { %v1515_v32 = vpop.eup %1514  ;;  %v1046_v33 = vmul.f32 -1.442695, %v1882_v29 }
  0xf7   :  { %v1517_v34 = vpop.eup %1516  ;;  %v297_v35 = vadd.f32 1.0, %v1515_v32  ;;  %v1045_v36 = vmul.f32 -1.442695, %v1885_v31  ;;  %v1208_v37 = vpop.f32.mrb[8].mxu0 }
  0xf8   :  { %v296_v38 = vadd.f32 1.0, %v1517_v34  ;;  %1526 = vpow2.f32 %v1046_v33  ;;  %v1890_v39 = vadd.f32 %v1208_v37, %v1855_v9  ;;  %v209_v40 = vpop.f32.mrb[9].mxu0 }
  0xf9   :  { %1528 = vrcp.f32 %v297_v35  ;;  %v1893_v41 = vadd.f32 %v1855_v9, %v209_v40 }
  0xfa   :  { %v1519_v42 = vpop.eup %1518  ;;  %1530 = vrcp.f32 %v296_v38  ;;  %v1048_v43 = vmul.f32 -1.442695, %v1890_v39 }
  0xfb   :  { %v1521_v44 = vpop.eup %1520  ;;  %v299_v45 = vadd.f32 1.0, %v1519_v42  ;;  %1532 = vpow2.f32 %v1045_v36  ;;  %v1047_v46 = vmul.f32 -1.442695, %v1893_v41  ;;  %v1211_v47 = vpop.f32.mrb[10].mxu0 }
  0xfc   :  { %v298_v48 = vadd.f32 1.0, %v1521_v44  ;;  %1534 = vpow2.f32 %v1048_v43  ;;  %v1898_v49 = vadd.f32 %v1211_v47, %v1855_v9  ;;  %v219_v50 = vpop.f32.mrb[11].mxu0 }
  0xfd   :  { %1536 = vrcp.f32 %v299_v45  ;;  %v1901_v51 = vadd.f32 %v1855_v9, %v219_v50 }
  0xfe   :  { %v1523_v52 = vpop.eup %1522  ;;  %1538 = vrcp.f32 %v298_v48  ;;  %v1050_v53 = vmul.f32 -1.442695, %v1898_v49 }
  0xff   :  { %v1525_v54 = vpop.eup %1524  ;;  %v301_v56 = vadd.f32 1.0, %v1523_v52  ;;  %1540 = vpow2.f32 %v1047_v46  ;;  %v1049_v58 = vmul.f32 -1.442695, %v1901_v51  ;;  %v1214_v59 = vpop.f32.mrb[12].mxu0 }
 0x100   :  { %v300_v61 = vadd.f32 1.0, %v1525_v54  ;;  %1542 = vpow2.f32 %v1050_v53  ;;  %v1906_v62 = vadd.f32 %v1214_v59, %v1855_v9  ;;  %v229_v0 = vpop.f32.mrb[13].mxu0 }
 0x101   :  { %1544 = vrcp.f32 %v301_v56  ;;  %v1909_v1 = vadd.f32 %v1855_v9, %v229_v0 }
 0x102   :  { %v1527_v3 = vpop.eup %1526  ;;  %1546 = vrcp.f32 %v300_v61  ;;  %v1052_v4 = vmul.f32 -1.442695, %v1906_v62 }
 0x103   :  { %v1529_v6 = vpop.eup %1528  ;;  %v303_v7 = vadd.f32 1.0, %v1527_v3  ;;  %1548 = vpow2.f32 %v1049_v58  ;;  %v1051_v10 = vmul.f32 -1.442695, %v1909_v1  ;;  %v1217_v12 = vpop.f32.mrb[14].mxu0 }
 0x104   :  { %v1531_v14 = vpop.eup %1530  ;;  %1550 = vpow2.f32 %v1052_v4  ;;  %v1914_v15 = vadd.f32 %v1217_v12, %v1855_v9  ;;  %v239_v16 = vpop.f32.mrb[15].mxu0  ;;  %v345_v24 = vmul.f32 %v1529_v6, %v1858_v11 }
 0x105   :  { %v1533_v18 = vpop.eup %1532  ;;  %v1917_v20 = vadd.f32 %v1855_v9, %v239_v16  ;;  %v344_v21 = vmul.f32 %v1531_v14, %v1861_v13  ;;  %1552 = vpow2.f32 %v1051_v10  ;;  %v1966_v14 = vld [vmem:[%s2277_s4] ss:$0 sm:$0xff] }
 0x106   :  { %v1535_v22 = vpop.eup %1534  ;;  %v302_v26 = vadd.f32 1.0, %v1533_v18  ;;  %v1054_v27 = vmul.f32 -1.442695, %v1914_v15  ;;  %1554 = vrcp.f32 %v303_v7 }
 0x107   :  { %v1537_v28 = vpop.eup %1536  ;;  %v305_v30 = vadd.f32 1.0, %v1535_v22  ;;  %v1053_v32 = vmul.f32 -1.442695, %v1917_v20  ;;  %1250 = vmatprep.mubr.f32.mxu1 %v344_v21 }
 0x108   :  { %v1539_v33 = vpop.eup %1538  ;;  %1556 = vrcp.f32 %v302_v26  ;;  %1251 = vmatmul.mubr.f32.vlgmr.msra.gmra.mrb[0].mxu1 %v345_v24  ;;  %v347_v13 = vmul.f32 %v1537_v28, %v1866_v17 }
 0x109   :  { %v1541_v9 = vpop.eup %1540  ;;  %v346_v34 = vmul.f32 %v1539_v33, %v1869_v19  ;;  %1558 = vrcp.f32 %v305_v30  ;;  %1506 = vmatpush3.bf16.msra.mxu1 %v1790_v55 }
 0x10a   :  { %v1543_v11 = vpop.eup %1542  ;;  %v304_v35 = vadd.f32 1.0, %v1541_v9  ;;  %1560 = vpow2.f32 %v1054_v27  ;;  %1499 = vmatprep.subr.bf16.mxu1 %v1795_v57 }
 0x10b   :  { %v1545_v36 = vpop.eup %1544  ;;  %v307_v37 = vadd.f32 1.0, %v1543_v11  ;;  %1562 = vpow2.f32 %v1053_v32  ;;  %1253 = vmatprep.mubr.f32.mxu1 %v346_v34 }
 0x10c   :  { %v1547_v38 = vpop.eup %1546  ;;  %1564 = vrcp.f32 %v304_v35  ;;  %1254 = vmatmul.mubr.f32.gmra.mrb[2].mxu1 %v347_v13  ;;  %v349_v43 = vmul.f32 %v1545_v36, %v1874_v23 }
 0x10d   :  { %v1549_v40 = vpop.eup %1548  ;;  %v348_v19 = vmul.f32 %v1547_v38, %v1877_v25  ;;  %1507 = vmatpush3.bf16.msra.mxu1 %v1795_v57  ;;  %1566 = vrcp.f32 %v307_v37 }
 0x10e   :  { %v1551_v42 = vpop.eup %1550  ;;  %v306_v17 = vadd.f32 1.0, %v1549_v40  ;;  %1500 = vmatprep.subr.bf16.mxu1 %v1807_v60 }
 0x10f   :  { %v309_v44 = vadd.f32 1.0, %v1551_v42  ;;  %1256 = vmatprep.mubr.f32.mxu1 %v348_v19  ;;  %v1553_v45 = vpop.eup %1552 }
 0x110   :  { %1568 = vrcp.f32 %v306_v17  ;;  %1257 = vmatmul.mubr.f32.gmra.mrb[4].mxu1 %v349_v43  ;;  %v1555_v46 = vpop.eup %1554  ;;  %v308_v47 = vadd.f32 1.0, %v1553_v45 }
 0x111   :  { %1508 = vmatpush3.bf16.msra.mxu1 %v1807_v60  ;;  %1570 = vrcp.f32 %v309_v44  ;;  %v351_v52 = vmul.f32 %v1555_v46, %v1882_v29 }
 0x112   :  { %v1557_v48 = vpop.eup %1556  ;;  %1501 = vmatprep.subr.bf16.mxu1 %v1817_v63  ;;  %1572 = vrcp.f32 %v308_v47 }
 0x113   :  { %v1559_v25 = vpop.eup %1558  ;;  %v350_v23 = vmul.f32 %v1557_v48, %v1885_v31 }
 0x114   :  { %v1561_v50 = vpop.eup %1560  ;;  %v353_v61 = vmul.f32 %v1559_v25, %v1890_v39 }
 0x115   :  { %v1563_v53 = vpop.eup %1562  ;;  %v311_v54 = vadd.f32 1.0, %v1561_v50  ;;  %1259 = vmatprep.mubr.f32.mxu1 %v350_v23  ;;  %1509 = vmatpush3.bf16.msra.mxu1 %v1817_v63 }
 0x116   :  { %v1565_v56 = vpop.eup %1564  ;;  %v310_v58 = vadd.f32 1.0, %v1563_v53  ;;  %1260 = vmatmul.mubr.f32.gmra.mrb[6].mxu1 %v351_v52  ;;  %1502 = vmatprep.subr.bf16.mxu1 %v1827_v2 }
 0x117   :  { %v352_v59 = vmul.f32 %v1565_v56, %v1893_v41  ;;  %1574 = vrcp.f32 %v311_v54  ;;  %v1567_v31 = vpop.eup %1566 }
 0x118   :  { %1576 = vrcp.f32 %v310_v58  ;;  %v355_v4 = vmul.f32 %v1567_v31, %v1898_v49 }
 0x119   :  { %1262 = vmatprep.mubr.f32.mxu1 %v352_v59  ;;  %1510 = vmatpush3.bf16.msra.mxu1 %v1827_v2 }
 0x11a   :  { %v1569_v29 = vpop.eup %1568  ;;  %1263 = vmatmul.mubr.f32.gmra.mrb[8].mxu1 %v353_v61  ;;  %1503 = vmatprep.subr.bf16.mxu1 %v1837_v5 }
 0x11b   :  { %v354_v0 = vmul.f32 %v1569_v29, %v1901_v51  ;;  %v1571_v3 = vpop.eup %1570 }
 0x11c   :  { %v1573_v6 = vpop.eup %1572  ;;  %v357_v41 = vmul.f32 %v1571_v3, %v1906_v62  ;;  %v541_v62 = vld [vmem:[%s2275_s5 + $0x78] sm:$0xff] }
 0x11d   :  { %1265 = vmatprep.mubr.f32.mxu1 %v354_v0  ;;  %1511 = vmatpush3.bf16.msra.mxu1 %v1837_v5  ;;  %v356_v39 = vmul.f32 %v1573_v6, %v1909_v1  ;;  %v540_v1 = vld [vmem:[%s2275_s5 + $0x70] sm:$0xff] }
 0x11e   :  { %1266 = vmatmul.mubr.f32.gmra.mrb[10].mxu1 %v355_v4  ;;  %1504 = vmatprep.subr.bf16.mxu1 %v1847_v8  ;;  %v1956_v12 = vpack.c.bf16 %v541_v62, %v540_v1 }
 0x11f   :  { %1268 = vmatprep.mubr.f32.mxu1 %v356_v39 }
 0x120   :  { %1463 = vmatprep.subr.bf16.mxu0 %v1956_v12 }
 0x121   :  { %v1575_v7 = vpop.eup %1574  ;;  %1512 = vmatpush3.bf16.msra.mxu1 %v1847_v8  ;;  %1465 = vmatpush3.bf16.msra.mxu0 %v1956_v12 }
 0x122   :  { %v1577_v10 = vpop.eup %1576  ;;  %1269 = vmatmul.mubr.f32.gmra.mrb[12].mxu1 %v357_v41  ;;  %v359_v49 = vmul.f32 %v1575_v7, %v1914_v15  ;;  %1505 = vmatprep.subr.bf16.mxu1 %v1956_v12 }
 0x123   :  { %v358_v51 = vmul.f32 %v1577_v10, %v1917_v20  ;;  %1467 = vmatprep.subr.bf16.mxu0 %v1790_v55 }
 0x125   :  { %1271 = vmatprep.mubr.f32.mxu1 %v358_v51  ;;  %1513 = vmatpush3.bf16.msra.mxu1 %v1956_v12 }
 0x126   :  { %1272 = vmatmul.mubr.f32.gmra.mrb[14].mxu1 %v359_v49 }
 0x1db   :  { %v1252_v15 = vpop.f32.mrb[0].mxu1 }
 0x1dc   :  { %v447_v16 = vpop.f32.mrb[1].mxu1  ;;  %v1972_v20 = vadd.f32 %v1252_v15, %v1966_v14 }
 0x1dd   :  { %v1969_v18 = vadd.f32 %v1966_v14, %v447_v16 }
 0x1de   :  { %v688_v58 = vmul.f32 %v1972_v20, %v1972_v20 }
 0x1df   :  { %v1255_v21 = vpop.f32.mrb[2].mxu1  ;;  %1306 = vmatprep.mubr.f32.mxu0 %v1969_v18 }
 0x1e0   :  { %v457_v22 = vpop.f32.mrb[3].mxu1  ;;  %1307 = vmatmul.mubr.f32.vlgmr.msra.gmra.mrb[16].mxu0 %v1972_v20  ;;  %v1981_v26 = vadd.f32 %v1255_v21, %v1966_v14 }
 0x1e1   :  { %v1977_v24 = vadd.f32 %v1966_v14, %v457_v22  ;;  %1469 = vmatpush3.bf16.msra.mxu0 %v1790_v55 }
 0x1e2   :  { %1471 = vmatprep.subr.bf16.mxu0 %v1795_v57  ;;  %v690_v61 = vmul.f32 %v1981_v26, %v1981_v26 }
 0x1e3   :  { %v1258_v27 = vpop.f32.mrb[4].mxu1  ;;  %1309 = vmatprep.mubr.f32.mxu0 %v1977_v24  ;;  %v689_v59 = vmul.f32 %v1977_v24, %v1977_v24 }
 0x1e4   :  { %v1986_v28 = vadd.f32 %v1258_v27, %v1966_v14  ;;  %v467_v30 = vpop.f32.mrb[5].mxu1  ;;  %1310 = vmatmul.mubr.f32.gmra.mrb[18].mxu0 %v1981_v26 }
 0x1e5   :  { %v1990_v32 = vadd.f32 %v1966_v14, %v467_v30  ;;  %1473 = vmatpush3.bf16.msra.mxu0 %v1795_v57 }
 0x1e6   :  { %1475 = vmatprep.subr.bf16.mxu0 %v1807_v60  ;;  %v692_v33 = vmul.f32 %v1986_v28, %v1986_v28 }
 0x1e7   :  { %1312 = vmatprep.mubr.f32.mxu0 %v1990_v32  ;;  %v691_v55 = vmul.f32 %v1990_v32, %v1990_v32 }
 0x1e8   :  { %1313 = vmatmul.mubr.f32.gmra.mrb[20].mxu0 %v1986_v28 }
 0x1e9   :  { %v1261_v9 = vpop.f32.mrb[6].mxu1  ;;  %1477 = vmatpush3.bf16.msra.mxu0 %v1807_v60  ;;  %1368 = vmatprep.mubr.f32.mxu1 %v691_v55 }
 0x1ea   :  { %v2002_v34 = vadd.f32 %v1261_v9, %v1966_v14  ;;  %v477_v57 = vpop.f32.mrb[7].mxu1  ;;  %1369 = vmatmul.mubr.f32.vlgmr.msra.gmra.mrb[16].mxu1 %v692_v33  ;;  %1479 = vmatprep.subr.bf16.mxu0 %v1817_v63 }
 0x1eb   :  { %v2006_v11 = vadd.f32 %v1966_v14, %v477_v57 }
 0x1ec   :  { %v694_v37 = vmul.f32 %v2002_v34, %v2002_v34 }
 0x1ed   :  { %v1264_v13 = vpop.f32.mrb[8].mxu1  ;;  %1315 = vmatprep.mubr.f32.mxu0 %v2006_v11  ;;  %1481 = vmatpush3.bf16.msra.mxu0 %v1817_v63  ;;  %v693_v35 = vmul.f32 %v2006_v11, %v2006_v11 }
 0x1ee   :  { %v2013_v60 = vadd.f32 %v1264_v13, %v1966_v14  ;;  %v487_v36 = vpop.f32.mrb[9].mxu1  ;;  %1316 = vmatmul.mubr.f32.gmra.mrb[22].mxu0 %v2002_v34  ;;  %1483 = vmatprep.subr.bf16.mxu0 %v1827_v2 }
 0x1ef   :  { %v2020_v38 = vadd.f32 %v1966_v14, %v487_v36  ;;  %1371 = vmatprep.mubr.f32.mxu1 %v693_v35 }
 0x1f0   :  { %1372 = vmatmul.mubr.f32.gmra.mrb[18].mxu1 %v694_v37  ;;  %v696_v43 = vmul.f32 %v2013_v60, %v2013_v60 }
 0x1f1   :  { %v1267_v63 = vpop.f32.mrb[10].mxu1  ;;  %1318 = vmatprep.mubr.f32.mxu0 %v2020_v38  ;;  %1485 = vmatpush3.bf16.msra.mxu0 %v1827_v2  ;;  %v695_v40 = vmul.f32 %v2020_v38, %v2020_v38 }
 0x1f2   :  { %v2027_v19 = vadd.f32 %v1267_v63, %v1966_v14  ;;  %v497_v42 = vpop.f32.mrb[11].mxu1  ;;  %1319 = vmatmul.mubr.f32.gmra.mrb[24].mxu0 %v2013_v60  ;;  %1487 = vmatprep.subr.bf16.mxu0 %v1837_v5 }
 0x1f3   :  { %v2034_v17 = vadd.f32 %v1966_v14, %v497_v42  ;;  %1374 = vmatprep.mubr.f32.mxu1 %v695_v40 }
 0x1f4   :  { %1375 = vmatmul.mubr.f32.gmra.mrb[20].mxu1 %v696_v43  ;;  %v698_v47 = vmul.f32 %v2027_v19, %v2027_v19 }
 0x1f5   :  { %v1270_v2 = vpop.f32.mrb[12].mxu1  ;;  %1321 = vmatprep.mubr.f32.mxu0 %v2034_v17  ;;  %1489 = vmatpush3.bf16.msra.mxu0 %v1837_v5  ;;  %v697_v44 = vmul.f32 %v2034_v17, %v2034_v17 }
 0x1f6   :  { %v2041_v45 = vadd.f32 %v1270_v2, %v1966_v14  ;;  %v507_v46 = vpop.f32.mrb[13].mxu1  ;;  %1322 = vmatmul.mubr.f32.gmra.mrb[26].mxu0 %v2027_v19  ;;  %1491 = vmatprep.subr.bf16.mxu0 %v1847_v8 }
 0x1f7   :  { %v2048_v48 = vadd.f32 %v1966_v14, %v507_v46  ;;  %1377 = vmatprep.mubr.f32.mxu1 %v697_v44 }
 0x1f8   :  { %1378 = vmatmul.mubr.f32.gmra.mrb[22].mxu1 %v698_v47  ;;  %v700_v52 = vmul.f32 %v2041_v45, %v2041_v45 }
 0x1f9   :  { %v1273_v5 = vpop.f32.mrb[14].mxu1  ;;  %1324 = vmatprep.mubr.f32.mxu0 %v2048_v48  ;;  %1493 = vmatpush3.bf16.msra.mxu0 %v1847_v8  ;;  %v699_v25 = vmul.f32 %v2048_v48, %v2048_v48  ;;  %v687_v8 = vmul.f32 %v1969_v18, %v1969_v18 }
 0x1fa   :  { %v2055_v23 = vadd.f32 %v1273_v5, %v1966_v14  ;;  %v517_v50 = vpop.f32.mrb[15].mxu1  ;;  %1325 = vmatmul.mubr.f32.gmra.mrb[28].mxu0 %v2041_v45  ;;  %1495 = vmatprep.subr.bf16.mxu0 %v1956_v12 }
 0x1fb   :  { %v2062_v53 = vadd.f32 %v1966_v14, %v517_v50  ;;  %1380 = vmatprep.mubr.f32.mxu1 %v699_v25 }
 0x1fc   :  { %1381 = vmatmul.mubr.f32.gmra.mrb[24].mxu1 %v700_v52  ;;  %v702_v56 = vmul.f32 %v2055_v23, %v2055_v23 }
 0x1fd   :  { %1327 = vmatprep.mubr.f32.mxu0 %v2062_v53  ;;  %1497 = vmatpush3.bf16.msra.mxu0 %v1956_v12  ;;  %v701_v54 = vmul.f32 %v2062_v53, %v2062_v53 }
 0x1fe   :  { %1328 = vmatmul.mubr.f32.gmra.mrb[30].mxu0 %v2055_v23 }
 0x1ff   :  { %1362 = vmatprep.mubr.f32.mxu0 %v687_v8  ;;  %1383 = vmatprep.mubr.f32.mxu1 %v701_v54 }
 0x200   :  { %1384 = vmatmul.mubr.f32.gmra.mrb[26].mxu1 %v702_v56 }
 0x202   :  { %1363 = vmatmul.mubr.f32.vlgmr.msra.gmra.mrb[32].mxu0 %v688_v58 }
 0x203   :  { %1365 = vmatprep.mubr.f32.mxu0 %v689_v59 }
 0x206   :  { %1366 = vmatmul.mubr.f32.gmra.mrb[34].mxu0 %v690_v61 }
 0x2b3   :  { %v2079_v31 = vpop.f32.mrb[16].mxu0 }
 0x2b4   :  { %v2081_v29 = vpop.f32.mrb[17].mxu0  ;;  %v2117_v54 = vmul.f32 %v2079_v31, %v2079_v31 }
 0x2b5   :  { %v2121_v56 = vmul.f32 %v2081_v29, %v2081_v29 }
 0x2b7   :  { %v2083_v0 = vpop.f32.mrb[18].mxu0 }
 0x2b8   :  { %v2085_v3 = vpop.f32.mrb[19].mxu0 }
 0x2bb   :  { %v1314_v4 = vpop.f32.mrb[20].mxu0 }
 0x2bc   :  { %v853_v6 = vmul.f32 %v1314_v4, %v1314_v4  ;;  %v2087_v39 = vpop.f32.mrb[21].mxu0 }
 0x2bd   :  { %v852_v41 = vmul.f32 %v2087_v39, %v2087_v39  ;;  %v1370_v7 = vpop.f32.mrb[16].mxu1 }
 0x2be   :  { %v869_v10 = vsub.f32 %v1370_v7, %v853_v6  ;;  %v789_v51 = vpop.f32.mrb[17].mxu1  ;;  %v2125_v6 = vmul.f32 %v2083_v0, %v2083_v0 }
 0x2bf   :  { %v868_v49 = vsub.f32 %v789_v51, %v852_v41  ;;  %v901_v41 = vsub.f32 %v1986_v28, %v1314_v4 }
 0x2c0   :  { %v885_v1 = vmax.f32 %v869_v10, 0.0 }
 0x2c1   :  { %v884_v62 = vmax.f32 %v868_v49, 0.0  ;;  %v2091_v12 = vpop.f32.mrb[22].mxu0 }
 0x2c2   :  { %v917_v14 = vadd.f32 1e-05, %v885_v1  ;;  %v855_v15 = vmul.f32 %v2091_v12, %v2091_v12  ;;  %v2095_v16 = vpop.f32.mrb[23].mxu0  ;;  %v2133_v1 = vld [vmem:[%s2277_s4 + $0x1] ss:$0 sm:$0xff] }
 0x2c3   :  { %v916_v21 = vadd.f32 1e-05, %v884_v62  ;;  %v854_v22 = vmul.f32 %v2095_v16, %v2095_v16  ;;  %v1373_v27 = vpop.f32.mrb[18].mxu1  ;;  %v900_v62 = vsub.f32 %v1990_v32, %v2087_v39  ;;  %v2150_v32 = vmul.f32 %v2085_v3, %v2085_v3 }
 0x2c4   :  { %1578 = vrsqrt.f32 %v917_v14  ;;  %v871_v30 = vsub.f32 %v1373_v27, %v855_v15  ;;  %v799_v55 = vpop.f32.mrb[19].mxu1 }
 0x2c5   :  { %1580 = vrsqrt.f32 %v916_v21  ;;  %v870_v33 = vsub.f32 %v799_v55, %v854_v22  ;;  %v2099_v9 = vpop.f32.mrb[24].mxu0  ;;  %v2146_v55 = vld [vmem:[%s2277_s4 + $0x2] ss:$0 sm:$0xff] }
 0x2c6   :  { %v887_v57 = vmax.f32 %v871_v30, 0.0  ;;  %v857_v13 = vmul.f32 %v2099_v9, %v2099_v9  ;;  %v2103_v35 = vpop.f32.mrb[25].mxu0 }
 0x2c7   :  { %v886_v36 = vmax.f32 %v870_v33, 0.0  ;;  %v856_v37 = vmul.f32 %v2103_v35, %v2103_v35  ;;  %v1376_v63 = vpop.f32.mrb[20].mxu1 }
 0x2c8   :  { %v919_v40 = vadd.f32 1e-05, %v887_v57  ;;  %v873_v42 = vsub.f32 %v1376_v63, %v857_v13  ;;  %v809_v43 = vpop.f32.mrb[21].mxu1 }
 0x2c9   :  { %v918_v2 = vadd.f32 1e-05, %v886_v36  ;;  %v872_v44 = vsub.f32 %v809_v43, %v856_v37  ;;  %v2107_v46 = vpop.f32.mrb[26].mxu0  ;;  %v903_v37 = vsub.f32 %v2002_v34, %v2091_v12 }
 0x2ca   :  { %1582 = vrsqrt.f32 %v919_v40  ;;  %v889_v47 = vmax.f32 %v873_v42, 0.0  ;;  %v859_v5 = vmul.f32 %v2107_v46, %v2107_v46  ;;  %v2111_v25 = vpop.f32.mrb[27].mxu0 }
 0x2cb   :  { %1584 = vrsqrt.f32 %v918_v2  ;;  %v888_v50 = vmax.f32 %v872_v44, 0.0  ;;  %v858_v52 = vmul.f32 %v2111_v25, %v2111_v25  ;;  %v1379_v8 = vpop.f32.mrb[22].mxu1 }
 0x2cc   :  { %v921_v58 = vadd.f32 1e-05, %v889_v47  ;;  %v875_v59 = vsub.f32 %v1379_v8, %v859_v5  ;;  %v819_v61 = vpop.f32.mrb[23].mxu1 }
 0x2cd   :  { %v920_v7 = vadd.f32 1e-05, %v888_v50  ;;  %v874_v10 = vsub.f32 %v819_v61, %v858_v52  ;;  %v2128_v51 = vpop.f32.mrb[28].mxu0  ;;  %v902_v50 = vsub.f32 %v2006_v11, %v2095_v16  ;;  %v904_v16 = vsub.f32 %v2020_v38, %v2103_v35 }
 0x2ce   :  { %v1579_v49 = vpop.eup %1578  ;;  %1586 = vrsqrt.f32 %v921_v58  ;;  %v891_v14 = vmax.f32 %v875_v59, 0.0  ;;  %v861_v15 = vmul.f32 %v2128_v51, %v2128_v51  ;;  %v2139_v21 = vpop.f32.mrb[29].mxu0  ;;  %v905_v58 = vsub.f32 %v2013_v60, %v2099_v9 }
 0x2cf   :  { %v1581_v28 = vpop.eup %1580  ;;  %v949_v4 = vmul.f32 %v1579_v49, %v901_v41  ;;  %1588 = vrsqrt.f32 %v920_v7  ;;  %v890_v22 = vmax.f32 %v874_v10, 0.0  ;;  %v860_v27 = vmul.f32 %v2139_v21, %v2139_v21  ;;  %v1382_v30 = vpop.f32.mrb[24].mxu1 }
 0x2d0   :  { %v948_v39 = vmul.f32 %v1581_v28, %v900_v62  ;;  %v923_v33 = vadd.f32 1e-05, %v891_v14  ;;  %v877_v57 = vsub.f32 %v1382_v30, %v861_v15  ;;  %v829_v13 = vpop.f32.mrb[25].mxu1 }
 0x2d1   :  { %v970_v36 = vmul.f32 %v2133_v1, %v949_v4  ;;  %v922_v63 = vadd.f32 1e-05, %v890_v22  ;;  %v876_v40 = vsub.f32 %v829_v13, %v860_v27  ;;  %v2155_v42 = vpop.f32.mrb[30].mxu0  ;;  %v907_v27 = vsub.f32 %v2027_v19, %v2107_v46 }
 0x2d2   :  { %v969_v43 = vmul.f32 %v2133_v1, %v948_v39  ;;  %1590 = vrsqrt.f32 %v923_v33  ;;  %v893_v2 = vmax.f32 %v877_v57, 0.0  ;;  %v863_v44 = vmul.f32 %v2155_v42, %v2155_v42  ;;  %v2160_v47 = vpop.f32.mrb[31].mxu0 }
 0x2d3   :  { %v991_v5 = vadd.f32 %v2146_v55, %v970_v36  ;;  %1592 = vrsqrt.f32 %v922_v63  ;;  %v892_v34 = vmax.f32 %v876_v40, 0.0  ;;  %v1385_v12 = vpop.f32.mrb[26].mxu1  ;;  %v862_v61 = vmul.f32 %v2160_v47, %v2160_v47 }
 0x2d4   :  { %v1583_v52 = vpop.eup %1582  ;;  %v990_v8 = vadd.f32 %v2146_v55, %v969_v43  ;;  %v925_v59 = vadd.f32 1e-05, %v893_v2  ;;  %v839_v41 = vpop.f32.mrb[27].mxu1  ;;  %v879_v49 = vsub.f32 %v1385_v12, %v863_v44 }
 0x2d5   :  { %v1585_v7 = vpop.eup %1584  ;;  %1007 = vst [vmem:[%s2278_s6 + $0x28] sm:$0xff] %v991_v5  ;;  %v951_v11 = vmul.f32 %v1583_v52, %v903_v37  ;;  %v924_v10 = vadd.f32 1e-05, %v892_v34  ;;  %v1364_v62 = vpop.f32.mrb[32].mxu0  ;;  %v878_v9 = vsub.f32 %v839_v41, %v862_v61  ;;  %v906_v34 = vsub.f32 %v2034_v17, %v2111_v25 }
 0x2d6   :  { %1006 = vst [vmem:[%s2278_s6 + $0x20] sm:$0xff] %v990_v8  ;;  %v950_v60 = vmul.f32 %v1585_v7, %v902_v50  ;;  %1594 = vrsqrt.f32 %v925_v59  ;;  %v865_v14 = vsub.f32 %v1364_v62, %v2117_v54  ;;  %v769_v15 = vpop.f32.mrb[33].mxu0  ;;  %v895_v4 = vmax.f32 %v879_v49, 0.0 }
 0x2d7   :  { %v972_v28 = vmul.f32 %v2133_v1, %v951_v11  ;;  %1596 = vrsqrt.f32 %v924_v10  ;;  %v864_v22 = vsub.f32 %v769_v15, %v2121_v56  ;;  %v894_v30 = vmax.f32 %v878_v9, 0.0 }
 0x2d8   :  { %v1587_v38 = vpop.eup %1586  ;;  %v971_v35 = vmul.f32 %v2133_v1, %v950_v60  ;;  %v881_v39 = vmax.f32 %v865_v14, 0.0  ;;  %v927_v54 = vadd.f32 1e-05, %v895_v4  ;;  %v909_v25 = vsub.f32 %v2041_v45, %v2128_v51 }
 0x2d9   :  { %v1589_v33 = vpop.eup %1588  ;;  %v993_v57 = vadd.f32 %v2146_v55, %v972_v28  ;;  %v953_v13 = vmul.f32 %v1587_v38, %v905_v58  ;;  %v880_v36 = vmax.f32 %v864_v22, 0.0  ;;  %v1367_v37 = vpop.f32.mrb[34].mxu0  ;;  %v926_v43 = vadd.f32 1e-05, %v894_v30 }
 0x2da   :  { %v992_v63 = vadd.f32 %v2146_v55, %v971_v35  ;;  %v952_v40 = vmul.f32 %v1589_v33, %v904_v16  ;;  %v913_v56 = vadd.f32 1e-05, %v881_v39  ;;  %v779_v2 = vpop.f32.mrb[35].mxu0  ;;  %1598 = vrsqrt.f32 %v927_v54 }
 0x2db   :  { %1009 = vst [vmem:[%s2278_s6 + $0x38] sm:$0xff] %v993_v57  ;;  %v974_v19 = vmul.f32 %v2133_v1, %v953_v13  ;;  %v912_v46 = vadd.f32 1e-05, %v880_v36  ;;  %v867_v44 = vsub.f32 %v1367_v37, %v2125_v6  ;;  %1600 = vrsqrt.f32 %v926_v43 }
 0x2dc   :  { %v1591_v5 = vpop.eup %1590  ;;  %1008 = vst [vmem:[%s2278_s6 + $0x30] sm:$0xff] %v992_v63  ;;  %v973_v50 = vmul.f32 %v2133_v1, %v952_v40  ;;  %v866_v12 = vsub.f32 %v779_v2, %v2150_v32  ;;  %1602 = vrsqrt.f32 %v913_v56  ;;  %v908_v16 = vsub.f32 %v2048_v48, %v2139_v21 }
 0x2dd   :  { %v1593_v52 = vpop.eup %1592  ;;  %v995_v8 = vadd.f32 %v2146_v55, %v974_v19  ;;  %v955_v58 = vmul.f32 %v1591_v5, %v907_v27  ;;  %v883_v59 = vmax.f32 %v867_v44, 0.0  ;;  %1604 = vrsqrt.f32 %v912_v46 }
 0x2de   :  { %v994_v6 = vadd.f32 %v2146_v55, %v973_v50  ;;  %v954_v61 = vmul.f32 %v1593_v52, %v906_v34  ;;  %v882_v41 = vmax.f32 %v866_v12, 0.0  ;;  %v911_v21 = vsub.f32 %v2055_v23, %v2155_v42 }
 0x2df   :  { %1011 = vst [vmem:[%s2278_s6 + $0x48] sm:$0xff] %v995_v8  ;;  %v976_v17 = vmul.f32 %v2133_v1, %v955_v58  ;;  %v915_v32 = vadd.f32 1e-05, %v883_v59  ;;  %v910_v28 = vsub.f32 %v2062_v53, %v2160_v47  ;;  %v897_v22 = vsub.f32 %v1972_v20, %v2079_v31 }
 0x2e0   :  { %v1595_v7 = vpop.eup %1594  ;;  %1010 = vst [vmem:[%s2278_s6 + $0x40] sm:$0xff] %v994_v6  ;;  %v975_v11 = vmul.f32 %v2133_v1, %v954_v61  ;;  %v914_v10 = vadd.f32 1e-05, %v882_v41  ;;  %v896_v30 = vsub.f32 %v1969_v18, %v2081_v29  ;;  %v899_v39 = vsub.f32 %v1981_v26, %v2083_v0 }
 0x2e1   :  { %v1597_v49 = vpop.eup %1596  ;;  %v997_v62 = vadd.f32 %v2146_v55, %v976_v17  ;;  %v957_v60 = vmul.f32 %v1595_v7, %v909_v25  ;;  %1606 = vrsqrt.f32 %v915_v32  ;;  %v898_v57 = vsub.f32 %v1977_v24, %v2085_v3 }
 0x2e2   :  { %v996_v9 = vadd.f32 %v2146_v55, %v975_v11  ;;  %v956_v45 = vmul.f32 %v1597_v49, %v908_v16  ;;  %1608 = vrsqrt.f32 %v914_v10 }
 0x2e3   :  { %1013 = vst [vmem:[%s2278_s6 + $0x58] sm:$0xff] %v997_v62  ;;  %v978_v51 = vmul.f32 %v2133_v1, %v957_v60 }
 0x2e4   :  { %1012 = vst [vmem:[%s2278_s6 + $0x50] sm:$0xff] %v996_v9  ;;  %v977_v48 = vmul.f32 %v2133_v1, %v956_v45  ;;  %v1599_v14 = vpop.eup %1598 }
 0x2e5   :  { %v999_v15 = vadd.f32 %v2146_v55, %v978_v51  ;;  %v1601_v4 = vpop.eup %1600  ;;  %v959_v35 = vmul.f32 %v1599_v14, %v911_v21 }
 0x2e6   :  { %v998_v38 = vadd.f32 %v2146_v55, %v977_v48  ;;  %v1603_v27 = vpop.eup %1602  ;;  %v958_v23 = vmul.f32 %v1601_v4, %v910_v28 }
 0x2e7   :  { %1015 = vst [vmem:[%s2278_s6 + $0x68] sm:$0xff] %v999_v15  ;;  %v1605_v42 = vpop.eup %1604  ;;  %v980_v53 = vmul.f32 %v2133_v1, %v959_v35  ;;  %v945_v20 = vmul.f32 %v1603_v27, %v897_v22 }
 0x2e8   :  { %1014 = vst [vmem:[%s2278_s6 + $0x60] sm:$0xff] %v998_v38  ;;  %v979_v31 = vmul.f32 %v2133_v1, %v958_v23  ;;  %v944_v47 = vmul.f32 %v1605_v42, %v896_v30 }
 0x2e9   :  { %v1001_v18 = vadd.f32 %v2146_v55, %v980_v53  ;;  %v966_v29 = vmul.f32 %v2133_v1, %v945_v20 }
 0x2ea   :  { %v1000_v13 = vadd.f32 %v2146_v55, %v979_v31  ;;  %v965_v54 = vmul.f32 %v2133_v1, %v944_v47 }
 0x2eb   :  { %v1607_v33 = vpop.eup %1606  ;;  %1017 = vst [vmem:[%s2278_s6 + $0x78] sm:$0x1f] %v1001_v18  ;;  %v987_v37 = vadd.f32 %v2146_v55, %v966_v29 }
 0x2ec   :  { %v1609_v36 = vpop.eup %1608  ;;  %v947_v26 = vmul.f32 %v1607_v33, %v899_v39  ;;  %1016 = vst [vmem:[%s2278_s6 + $0x70] sm:$0xff] %v1000_v13  ;;  %v986_v0 = vadd.f32 %v2146_v55, %v965_v54 }
 0x2ed   :  { %v946_v63 = vmul.f32 %v1609_v36, %v898_v57  ;;  %1003 = vst [vmem:[%s2278_s6 + $0x8] sm:$0xff] %v987_v37 }
 0x2ee   :  { %v968_v24 = vmul.f32 %v2133_v1, %v947_v26  ;;  %1002 = vst [vmem:[%s2278_s6] sm:$0xff] %v986_v0 }
 0x2ef   :  { %v967_v3 = vmul.f32 %v2133_v1, %v946_v63 }
 0x2f0   :  { %v989_v40 = vadd.f32 %v2146_v55, %v968_v24 }
 0x2f1   :  { %v988_v43 = vadd.f32 %v2146_v55, %v967_v3 }
 0x2f2   :  { %1005 = vst [vmem:[%s2278_s6 + $0x18] sm:$0xff] %v989_v40 }
 0x2f3   :  { %1004 = vst [vmem:[%s2278_s6 + $0x10] sm:$0xff] %v988_v43 }

</bundles_post_ra>
